<compile_context>
chip_gen: v7x
topology: tpu7x:2x2x1
jax: 0.10.0
libtpu: 0.0.40
codegen_flags: <defaults>
</compile_context>

<pallas_src>
import jax
import jax.numpy as jnp
from jax.experimental import pallas as pl
from jax.experimental.pallas import tpu as pltpu


def _attention_kernel(enc_ref, q_ref, out_ref):
    """One grid step == one batch block (flash-attention style, one query/row).

    enc_ref: (Bt, S, H)  encoder outputs in native dtype (keys AND values)
    q_ref:   (Bt, 1, H)  collapsed score vector, replicated per batch row
    out_ref: (Bt, 1, H)  context vectors
    """
    enc = enc_ref[...]                                           # (Bt, S, H)
    q = q_ref[...]                                               # (Bt, 1, H)

    # Pre-softmax scores on the MXU with f32 accumulation.  The decoder-hidden
    # and bias contributions are constant along S and cancel in softmax, so
    # they never enter the kernel (see wrapper note).
    s = jnp.einsum('bqh,bkh->bqk', q, enc,
                   preferred_element_type=jnp.float32)           # (Bt, 1, S)

    # Max-shifted softmax over the sequence (lane) axis.
    m = jnp.max(s, axis=-1, keepdims=True)                       # (Bt, 1, 1)
    e = jnp.exp(s - m)                                           # (Bt, 1, S)
    denom = jnp.sum(e, axis=-1, keepdims=True)                   # (Bt, 1, 1)
    r = pl.reciprocal(denom, approx=True)                        # EUP slot
    r = r * (2.0 - denom * r)                                    # Newton step -> ~f32 exact
    w = e * r                                                    # (Bt, 1, S)

    # context = attention_weights @ encoder_outputs, also on the MXU.
    # (If garbage rows exist in a partial tail block they stay confined to
    #  those rows; Pallas masks their writeback, so valid rows are unaffected.)
    ctx = jnp.einsum('bqk,bkh->bqh', w.astype(enc.dtype), enc,
                     preferred_element_type=jnp.float32)         # (Bt, 1, H)
    out_ref[...] = ctx.astype(out_ref.dtype)


def attention_mechanism(decoder_hidden, encoder_outputs, params, *, block_b=None):
    """Forward pass of AttentionMechanism.

    decoder_hidden contributes only a per-batch constant to the pre-softmax
    scores (the module is purely affine before softmax), which cancels exactly
    in softmax, so it does not enter the kernel.
    """
    del decoder_hidden  # mathematically has no effect on the output (see note)
    B, S, H = encoder_outputs.shape
    w1, b1, w2, b2, w3, b3, w4, b4, w5 = params
    del b1, b2, b3, b4  # seq-constant in the scores -> cancel in softmax

    # Collapse fc1(enc slice)..fc4 and attention_weights_fc into one (1, H)
    # vector at full f32 precision (tiny matmuls; HIGHEST matches the torch
    # f32 chain exactly).  PyTorch Linear computes x @ W^T; W1a = w1[:, :H].
    hp = jax.lax.Precision.HIGHEST
    u = w5.astype(jnp.float32)
    for wmat in (w4, w3, w2, w1[:, :H]):
        u = jnp.matmul(u, wmat.astype(jnp.float32), precision=hp)   # (1, H)

    # Encoder outputs stay in their native dtype — no full-array astype/pad
    # copy in the wrapper (the kernel is strictly HBM-bandwidth bound).
    enc = encoder_outputs
    # Per-batch-row "query" = the collapsed vector, replicated (B*H bytes,
    # ~1/S of the encoder traffic — negligible).
    q = jnp.broadcast_to(u.reshape(1, 1, H), (B, 1, H)).astype(enc.dtype)

    # --- batch-block sizing against per-generation VMEM ----------------------
    isz = enc.dtype.itemsize
    h_pad = -(-H // 128) * 128       # lane padding of the (., H) tiles
    s_pad = -(-S // 8) * 8           # sublane padding of the (S, .) tiles
    # VMEM bytes per batch row: enc tile + q tile (padded to 8 sublanes) + out tile.
    per_b = (s_pad + 8) * h_pad * isz + 8 * h_pad * isz

    try:
        vmem_cap = int(pltpu.get_tpu_info().vmem_capacity_bytes)
    except Exception:
        vmem_cap = 64 * 1024 * 1024  # conservative (v7x per-TensorCore VMEM)

    # Per-buffer budget ~ VMEM/8: double-buffered inputs + output + headroom.
    # (v5e/v6e 128 MiB -> ~16 MiB/buffer, v7x 64 MiB -> ~8 MiB/buffer.)
    budget = max(per_b, vmem_cap // 8)
    if block_b is None:
        bt = budget // per_b
    else:
        bt = block_b
    # Cap keeps the per-block batched MXU contraction (which Mosaic expands per
    # batch row) bounded; below the cap bt is purely bytes-driven.
    bt = int(max(1, min(bt, B, 1024)))

    nb = pl.cdiv(B, bt)  # partial last block allowed: rows are independent and
    #                      Pallas masks the writeback of the out-of-range rows.

    base_limit = min(vmem_cap // 2, 64 * 1024 * 1024)
    needed = 2 * bt * per_b + (4 << 20)
    vmem_limit = int(min(vmem_cap, max(base_limit, needed)))

    out = pl.pallas_call(
        _attention_kernel,
        out_shape=jax.ShapeDtypeStruct((B, 1, H), enc.dtype),
        grid_spec=pltpu.PrefetchScalarGridSpec(
            num_scalar_prefetch=0,
            grid=(nb,),
            in_specs=[
                pl.BlockSpec((bt, S, H), lambda i: (i, 0, 0)),   # encoder outputs
                pl.BlockSpec((bt, 1, H), lambda i: (i, 0, 0)),   # per-row query
            ],
            out_specs=pl.BlockSpec((bt, 1, H), lambda i: (i, 0, 0)),
        ),
        compiler_params=pltpu.CompilerParams(
            # TODO(synk): on v7x, verify the 1-D "parallel" grid axis actually
            # shards across both TensorCores; otherwise add an explicit
            # core-parallel leading axis / pl.core_map over the TC mesh.
            dimension_semantics=("parallel",),
            vmem_limit_bytes=vmem_limit,
        ),
    )(enc, q)
    # TODO(synk): for H < 128 (e.g. this test's H=32) lane occupancy is H/128;
    # a lane-dense layout would require folding heads/features onto lanes.
    return out.reshape(B, H)


def attention_reference(decoder_hidden, encoder_outputs, params):
    """Pure-JAX replica of the PyTorch f32 forward, for verification."""
    B, S, H = encoder_outputs.shape
    w1, b1, w2, b2, w3, b3, w4, b4, w5 = params
    hp = jax.lax.Precision.HIGHEST
    dec = jnp.broadcast_to(decoder_hidden[:, None, :], (B, S, H))
    concat = jnp.concatenate([encoder_outputs, dec], axis=2).reshape(-1, 2 * H)
    x = jnp.matmul(concat, w1.T, precision=hp) + b1
    x = jnp.matmul(x, w2.T, precision=hp) + b2
    x = jnp.matmul(x, w3.T, precision=hp) + b3
    x = jnp.matmul(x, w4.T, precision=hp) + b4
    scores = jnp.matmul(x, w5.T, precision=hp).reshape(B, S)
    weights = jax.nn.softmax(scores, axis=1)
    return jnp.einsum('bs,bsh->bh', weights, encoder_outputs, precision=hp)


def init_params(key, hidden):
    ks = jax.random.split(key, 9)
    scale = 0.1
    w1 = scale * jax.random.normal(ks[0], (hidden, 2 * hidden), jnp.float32)
    b1 = scale * jax.random.normal(ks[1], (hidden,), jnp.float32)
    w2 = scale * jax.random.normal(ks[2], (hidden, hidden), jnp.float32)
    b2 = scale * jax.random.normal(ks[3], (hidden,), jnp.float32)
    w3 = scale * jax.random.normal(ks[4], (hidden, hidden), jnp.float32)
    b3 = scale * jax.random.normal(ks[5], (hidden,), jnp.float32)
    w4 = scale * jax.random.normal(ks[6], (hidden, hidden), jnp.float32)
    b4 = scale * jax.random.normal(ks[7], (hidden,), jnp.float32)
    w5 = scale * jax.random.normal(ks[8], (1, hidden), jnp.float32)
    return (w1, b1, w2, b2, w3, b3, w4, b4, w5)


if __name__ == "__main__":
    B, S, H = 2, 8, 32
    key = jax.random.PRNGKey(0)
    k_dec, k_enc, k_par = jax.random.split(key, 3)

    decoder_hidden = jax.random.normal(k_dec, (B, H), jnp.float32)
    encoder_outputs = jax.random.normal(k_enc, (B, S, H), jnp.float32)
    params = init_params(k_par, H)

    ctx = attention_mechanism(decoder_hidden, encoder_outputs, params)
    jax.block_until_ready(ctx)

    ref = attention_reference(decoder_hidden, encoder_outputs, params)
    assert ctx.shape == (B, H)
    err = float(jnp.max(jnp.abs(ctx - ref)))
    # Tolerance note: the in-kernel contractions run on the MXU; depending on
    # generation/compiler defaults, f32 matmuls may use bf16-pass decomposition,
    # bounding the error at ~5e-3 here (typical observed error is far smaller).
    assert jnp.allclose(ctx, ref, atol=5e-3, rtol=5e-3), f"max abs err = {err}"

    print("KERNEL_OK")
</pallas_src>

<mosaic_0001>
module attributes {stable_mosaic.version = 11 : i64} {
  func.func @_attention_kernel(%arg0: i32, %arg1: memref<2x8x32xf32, #tpu.memory_space<vmem>>, %arg2: memref<2x1x32xf32, #tpu.memory_space<vmem>>, %arg3: memref<2x1x32xf32, #tpu.memory_space<vmem>>) attributes {dimension_semantics = [#tpu.dimension_semantics<parallel>], iteration_bounds = array<i64: 1>, scalar_prefetch = 0 : i64, scratch_operands = 0 : i64, tpu.core_type = #tpu.core_type<tc>, window_params = [{transform_indices = @transform_0, window_bounds = array<i64: 2, 8, 32>}, {transform_indices = @transform_1, window_bounds = array<i64: 2, 1, 32>}, {transform_indices = @transform_2, window_bounds = array<i64: 2, 1, 32>}]} {
    %c0 = arith.constant 0 : index
    %c0_0 = arith.constant 0 : index
    %c0_1 = arith.constant 0 : index
    %0 = vector.load %arg1[%c0, %c0_0, %c0_1] : memref<2x8x32xf32, #tpu.memory_space<vmem>>, vector<2x8x32xf32>
    %c0_2 = arith.constant 0 : index
    %c0_3 = arith.constant 0 : index
    %c0_4 = arith.constant 0 : index
    %1 = vector.load %arg2[%c0_2, %c0_3, %c0_4] : memref<2x1x32xf32, #tpu.memory_space<vmem>>, vector<2x1x32xf32>
    "tpu.trace_start"() <{level = 10 : i32, message = "bqh,bkh->bqk"}> : () -> ()
    %cst = arith.constant dense<0.000000e+00> : vector<2x1x8xf32>
    %2 = tpu.matmul %1, %0, %cst {dimension_numbers = #tpu.dot_dimension_numbers<[2], [2], [1], [1], [0, 0, 0, 1, 1, 1], [0], [0]>} : vector<2x1x32xf32>, vector<2x8x32xf32>, vector<2x1x8xf32> -> vector<2x1x8xf32>
    "tpu.trace_stop"() : () -> ()
    %cst_5 = arith.constant dense<0xFF800000> : vector<2x1xf32>
    %3 = vector.multi_reduction <maximumf>, %2, %cst_5 [2] : vector<2x1x8xf32> to vector<2x1xf32>
    %4 = vector.shape_cast %3 : vector<2x1xf32> to vector<2x1x1xf32>
    %5 = vector.broadcast %4 : vector<2x1x1xf32> to vector<2x1x8xf32>
    %6 = arith.subf %2, %5 : vector<2x1x8xf32>
    %7 = math.exp %6 : vector<2x1x8xf32>
    %cst_6 = arith.constant dense<0.000000e+00> : vector<2x1xf32>
    %8 = vector.multi_reduction <add>, %7, %cst_6 [2] : vector<2x1x8xf32> to vector<2x1xf32>
    %9 = vector.shape_cast %8 : vector<2x1xf32> to vector<2x1x1xf32>
    %10 = tpu.reciprocal %9 {approx = true} : vector<2x1x1xf32> -> vector<2x1x1xf32>
    %11 = arith.mulf %9, %10 : vector<2x1x1xf32>
    %cst_7 = arith.constant 2.000000e+00 : f32
    %12 = vector.broadcast %cst_7 : f32 to vector<2x1x1xf32>
    %13 = arith.subf %12, %11 : vector<2x1x1xf32>
    %14 = arith.mulf %10, %13 : vector<2x1x1xf32>
    %15 = vector.broadcast %14 : vector<2x1x1xf32> to vector<2x1x8xf32>
    %16 = arith.mulf %7, %15 : vector<2x1x8xf32>
    "tpu.trace_start"() <{level = 10 : i32, message = "bqk,bkh->bqh"}> : () -> ()
    %cst_8 = arith.constant dense<0.000000e+00> : vector<2x1x32xf32>
    %17 = tpu.matmul %16, %0, %cst_8 {dimension_numbers = #tpu.dot_dimension_numbers<[2], [1], [1], [2], [0, 0, 0, 1, 1, 2], [0], [0]>} : vector<2x1x8xf32>, vector<2x8x32xf32>, vector<2x1x32xf32> -> vector<2x1x32xf32>
    "tpu.trace_stop"() : () -> ()
    %c0_9 = arith.constant 0 : index
    %c0_10 = arith.constant 0 : index
    %c0_11 = arith.constant 0 : index
    %18 = vector.load %arg3[%c0_9, %c0_10, %c0_11] : memref<2x1x32xf32, #tpu.memory_space<vmem>>, vector<2x1x32xf32>
    tpu.vector_store %arg3[%c0_9, %c0_10, %c0_11], %17 {strides = array<i32>} : memref<2x1x32xf32, #tpu.memory_space<vmem>>, vector<2x1x32xf32>,
    return
  }
  func.func @transform_0(%arg0: i32) -> (i32, i32, i32) {
    %c0_i32 = arith.constant 0 : i32
    %c0_i32_0 = arith.constant 0 : i32
    %c0_i32_1 = arith.constant 0 : i32
    return %arg0, %c0_i32, %c0_i32_0 : i32, i32, i32
  }
  func.func @transform_1(%arg0: i32) -> (i32, i32, i32) {
    %c0_i32 = arith.constant 0 : i32
    %c0_i32_0 = arith.constant 0 : i32
    %c0_i32_1 = arith.constant 0 : i32
    return %arg0, %c0_i32, %c0_i32_0 : i32, i32, i32
  }
  func.func @transform_2(%arg0: i32) -> (i32, i32, i32) {
    %c0_i32 = arith.constant 0 : i32
    %c0_i32_0 = arith.constant 0 : i32
    %c0_i32_1 = arith.constant 0 : i32
    return %arg0, %c0_i32, %c0_i32_0 : i32, i32, i32
  }
}

</mosaic_0001>

<bundles_post_ra>
// kernel: tpu_custom_call.1
= control target key start
LH: loop header
LB: loop body
LE: loop exit
PB: predicated region body
PF: predicated region fallthrough
CT: control target
= control target key end

     0   :  { %7 = vsyncpa [#allocation3], 0  ;;  %s538_s0 = inlined_call_operand.hbm [shape: f32[2,8,32], index: 0, kind: input, shape index: {}]   ;;  %s539_s1 = inlined_call_operand.vmem [shape: f32[2,1,32], index: 1, kind: input, shape index: {}]   ;;  %s540_s2 = inlined_call_operand.hbm [shape: f32[2,1,32], index: 2, kind: output, shape index: {}]  }
   0x1   :  { %8 = vsyncpa [#allocation4], 0  ;;  %s477_s9 = smov [#allocation2]   ;;  %s429_s13 = scalar_lea.hbm %s538_s0, 256 }
   0x2   :  { %s14_s10 = sshll.u32 %s477_s9, 4  ;;  %p430_p0 = scmp.ne.s32.totalorder %s538_s0, %s429_s13  ;;  %s15_s10 = int_to_ptr.vmem [resolvable:$true] %s14_s10 }
   0x3   :  { %p433_p1 = scmp.lt.u32.totalorder %s429_s13, %s538_s0 }
   0x5   :  { %p435_p2 = pnand %p433_p1, %p430_p0 }
   0x7   :  { %438 = shalt.err (!%p435_p2)
}
   0x8   :  { %s439_s18 = scalar_lea.vmem %s15_s10, 256  ;;  %p444_p4 = scmp.lt.s32.totalorder %s15_s10, %s15_s10 }
   0x9   :  { %p440_p3 = scmp.ne.s32.totalorder %s15_s10, %s439_s18  ;;  %p445_p5 = scmp.lt.s32.totalorder %s439_s18, %s439_s18 }
   0xb   :  { %p446_p6 = por %p445_p5, %p444_p4 }
   0xd   :  { %p447_p7 = pnand %p446_p6, %p440_p3 }
   0xf   :  { %450 = shalt.err (!%p447_p7)
}
  0x10   :  { %s478_s19 = smov 128   ;;  %s479_s20 = smov 8  }
  0x11   :  { %20 = dma.hbm_to_vmem [thread:$0]  %s538_s0, 256, %s15_s10, [#allocation3], %s478_s19, %s478_s19, %s479_s20  }
  0x12   :  { %473 = dma.done.wait [#allocation3], 256  }
  0x13   :  { %474 = vsyncadd [#allocation3], 4294967040  ;;  %v480_v0 = vmov 0.0   ;;  %vm481_vm0 = vmmov 0   ;;  %vm30_vm1 = vcmask 261120   ;;  %v26_v1 = vld [vmem:[#allocation2] sm:$0xff] }
  0x14   :  { %393 = vmatprep.subr.mxu0 %v480_v0  ;;  %395 = vmatprep.mubr.msk.f32.mxu0 %vm481_vm0, %v480_v0  ;;  %v27_v2 = vld [vmem:[#allocation2 + $0x8] sm:$0xff]  ;;  %v28_v3 = vld [vmem:[%s539_s1] sm:$0x1]  ;;  %v29_v4 = vld [vmem:[%s539_s1 + $0x1] sm:$0x1]  ;;  %vm183_vm2 = vcmask 57344  }
  0x15   :  { %398 = vmatprep.subr.mxu1 %v480_v0  ;;  %400 = vmatprep.mubr.msk.f32.mxu1 %vm481_vm0, %v480_v0  ;;  %vm212_vm3 = vcmask 64512   ;;  %vm359_vm4 = vcmask 253952   ;;  %s482_s1 = smov [#allocation5]  }
  0x16   :  { %394 = vmatpush3.xpose.msk.msra.mxu0 %vm30_vm1, %v26_v1  ;;  %399 = vmatpush3.xpose.msk.msra.mxu1 %vm30_vm1, %v27_v2  ;;  %s367_s26 = sshll.u32 %s482_s1, 4  ;;  %s368_s26 = int_to_ptr.vmem [resolvable:$true] %s367_s26 }
  0x17   :  { %403 = vmatprep.subr.mxu0 %v480_v0  ;;  %408 = vmatprep.subr.mxu1 %v480_v0  ;;  %s451_s27 = scalar_lea.vmem %s368_s26, 32  ;;  %p456_p9 = scmp.lt.s32.totalorder %s368_s26, %s368_s26 }
  0x18   :  { %p452_p8 = scmp.ne.s32.totalorder %s368_s26, %s451_s27  ;;  %p457_p10 = scmp.lt.s32.totalorder %s451_s27, %s451_s27 }
  0x19   :  { %396 = vmatmul.mubr.msk.f32.vlgmr.msra.gmra.mrb[0].mxu0 %vm30_vm1, %v28_v3  ;;  %401 = vmatmul.mubr.msk.f32.vlgmr.msra.gmra.mrb[0].mxu1 %vm30_vm1, %v29_v4 }
  0x1a   :  { %404 = vmatpush3.msra.mxu0 %v26_v1  ;;  %405 = vmatprep.mubr.msk.f32.mxu0 %vm481_vm0, %v480_v0  ;;  %p458_p11 = por %p457_p10, %p456_p9 }
  0x1b   :  { %409 = vmatpush3.msra.mxu1 %v27_v2  ;;  %410 = vmatprep.mubr.msk.f32.mxu1 %vm481_vm0, %v480_v0 }
  0x1c   :  { %p459_p12 = pnand %p458_p11, %p452_p8 }
  0xec   :  { %v103_v5 = vpop.f32.mrb[0].mxu0  ;;  %v179_v6 = vpop.f32.mrb[0].mxu1 }
  0xed   :  { %v397_v7 = vpop.f32.mrb[1].mxu0  ;;  %v184_v8 = vsel %vm183_vm2, %v103_v5, -inf  ;;  %v402_v9 = vpop.f32.mrb[1].mxu1  ;;  %v187_v10 = vsel %vm183_vm2, %v179_v6, -inf }
  0xee   :  { %185 = vmax.xlane.f32.xlu0 %v184_v8 }
  0xf2   :  { %188 = vmax.xlane.f32.xlu0 %v187_v10 }
 0x17b   :  { %v186_v11 = vpop.xlane.xlu0 %185 }
 0x17c   :  { %v190_v12 = vsub.f32 %v103_v5, %v186_v11 }
 0x17e   :  { %v192_v13 = vmul.f32 1.442695, %v190_v12 }
 0x17f   :  { %v189_v14 = vpop.xlane.xlu0 %188 }
 0x180   :  { %421 = vpow2.f32 %v192_v13  ;;  %v191_v15 = vsub.f32 %v179_v6, %v189_v14 }
 0x182   :  { %v194_v16 = vmul.f32 1.442695, %v191_v15 }
 0x184   :  { %423 = vpow2.f32 %v194_v16 }
 0x18a   :  { %v422_v17 = vpop.eup %421 }
 0x18b   :  { %v196_v18 = vsel %vm183_vm2, %v422_v17, 0.0 }
 0x18c   :  { %197 = vadd.xlane.f32.xlu1 %v196_v18 }
 0x18e   :  { %v424_v19 = vpop.eup %423 }
 0x18f   :  { %v199_v20 = vsel %vm183_vm2, %v424_v19, 0.0 }
 0x190   :  { %200 = vadd.xlane.f32.xlu1 %v199_v20 }
 0x219   :  { %v198_v21 = vpop.xlane.xlu1 %197 }
 0x21a   :  { %425 = vrcp.f32 %v198_v21 }
 0x21d   :  { %v201_v22 = vpop.xlane.xlu1 %200 }
 0x21e   :  { %427 = vrcp.f32 %v201_v22 }
 0x224   :  { %v426_v23 = vpop.eup %425 }
 0x225   :  { %v204_v24 = vmul.f32 %v426_v23, %v198_v21 }
 0x227   :  { %v206_v25 = vsub.f32 2.0, %v204_v24 }
 0x228   :  { %v428_v26 = vpop.eup %427 }
 0x229   :  { %v208_v27 = vmul.f32 %v426_v23, %v206_v25  ;;  %v205_v28 = vmul.f32 %v428_v26, %v201_v22 }
 0x22b   :  { %v210_v29 = vmul.f32 %v422_v17, %v208_v27  ;;  %v207_v30 = vsub.f32 2.0, %v205_v28 }
 0x22d   :  { %v209_v31 = vmul.f32 %v428_v26, %v207_v30  ;;  %406 = vmatmul.mubr.msk.f32.vlgmr.msra.gmra.mrb[2].mxu0 %vm212_vm3, %v210_v29 }
 0x22f   :  { %v211_v32 = vmul.f32 %v424_v19, %v209_v31 }
 0x231   :  { %411 = vmatmul.mubr.msk.f32.vlgmr.msra.gmra.mrb[2].mxu1 %vm212_vm3, %v211_v32 }
 0x300   :  { %v282_v33 = vpop.f32.mrb[2].mxu0 }
 0x301   :  { %360 = vst.msk [vmem:[#allocation5] sm:$0x1] %vm359_vm4, %v282_v33  ;;  %v407_v34 = vpop.f32.mrb[3].mxu0 }
 0x304   :  { %v355_v35 = vpop.f32.mrb[2].mxu1 }
 0x305   :  { %361 = vst.msk [vmem:[#allocation5 + $0x1] sm:$0x1] %vm359_vm4, %v355_v35  ;;  %v412_v36 = vpop.f32.mrb[3].mxu1 }
 0x306   :  { %462 = shalt.err (!%p459_p12)
}
 0x307   :  { %s463_s30 = scalar_lea.hbm %s540_s2, 32 }
 0x308   :  { %p464_p13 = scmp.ne.s32.totalorder %s540_s2, %s463_s30  ;;  %p467_p0 = scmp.lt.u32.totalorder %s463_s30, %s540_s2 }
 0x30a   :  { %p469_p1 = pnand %p467_p0, %p464_p13 }
 0x30c   :  { %472 = shalt.err (!%p469_p1)
}
 0x30d   :  { %s483_s7 = smov 16   ;;  %s484_s8 = smov 1  }
 0x30e   :  { %373 = dma.vmem_to_hbm [thread:$0]  %s368_s26, 32, %s540_s2, [#allocation4], %s483_s7, %s483_s7, %s484_s8  }
 0x30f   :  { %475 = dma.done.wait [#allocation4], 32  }
 0x310   :  { %476 = vsyncadd [#allocation4], 4294967264 }
 0x311   :  { %377 = vsyncpa [#allocation3], 1 }
 0x312   :  { %378 = vsyncpa [#allocation4], 1 }

</bundles_post_ra>
